<compile_context>
chip_gen: v6e
topology: v6e:2x2x1
jax: 0.10.0
libtpu: 0.0.40
codegen_flags: <defaults>
</compile_context>

<pallas_src>
import functools

import jax
import jax.numpy as jnp
from jax.experimental import pallas as pl
from jax.experimental.pallas import tpu as pltpu


def _round_up(a, b):
    return ((a + b - 1) // b) * b


def _simconv_kernel(p_ref, w_ref, bias_ref, o_ref):
    # p_ref:    (tm, Kp)   bf16  im2col patch tile (zero-padded contraction)
    # w_ref:    (Kp, Cp)   bf16  conv weight with BN scale folded in
    # bias_ref: (1,  Cp)   f32   folded BN bias
    # o_ref:    (tm, Cp)   f32   output tile (lane-dense: Cp % 128 == 0)
    acc = jnp.dot(p_ref[...], w_ref[...], preferred_element_type=jnp.float32)
    o_ref[...] = jnp.maximum(acc + bias_ref[...], 0.0).astype(o_ref.dtype)


def _im2col_nchw(x, k, stride, pad):
    """x: [N, C, H, W] -> patches [N*Ho*Wo, C*k*k] (K ordered cin, ki, kj)."""
    xp = jnp.pad(x, ((0, 0), (0, 0), (pad, pad), (pad, pad)))
    N, C, Hp, Wp = xp.shape
    Ho = (Hp - k) // stride + 1
    Wo = (Wp - k) // stride + 1
    cols = []
    for di in range(k):
        for dj in range(k):
            cols.append(
                xp[:, :, di:di + stride * Ho:stride, dj:dj + stride * Wo:stride]
            )
    p = jnp.stack(cols, axis=2)                          # [N, C, k*k, Ho, Wo]
    p = p.transpose(0, 3, 4, 1, 2).reshape(N * Ho * Wo, C * k * k)
    return p, Ho, Wo


@functools.partial(
    jax.jit, static_argnames=("kernel_size", "stride", "tm", "out_layout"))
def simconv_forward(x, weight, bn_gamma, bn_beta, bn_mean, bn_var,
                    kernel_size, stride, tm=512, eps=1e-5, out_layout="NCHW"):
    """SimConv forward: ReLU(BN(Conv2d(x))), inference-mode BatchNorm.

    x:      [N, Cin, H, W]   float32 (NCHW, as in PyTorch)
    weight: [Cout, Cin, k, k]
    returns [N, Cout, Ho, Wo] (NCHW) or [N, Ho, Wo, Cout] if out_layout="NHWC"
    """
    N, Cin, H, W = x.shape
    Cout = weight.shape[0]
    k = kernel_size
    pad = k // 2
    K = Cin * k * k

    # ---- fold BN (running stats) into weight scale + bias ----
    scale = bn_gamma * jax.lax.rsqrt(bn_var + eps)                 # [Cout]
    bias = bn_beta - bn_mean * scale                               # [Cout]
    w2d = weight.reshape(Cout, K).T * scale[None, :]               # [K, Cout] f32

    # ---- im2col in bf16 (halves patch-matrix HBM traffic) ----
    patches, Ho, Wo = _im2col_nchw(x.astype(jnp.bfloat16), k, stride, pad)
    M = N * Ho * Wo

    # ---- lane-dense padding of contraction (K) and output channels ----
    Kp = _round_up(K, 128)
    Cp = _round_up(Cout, 128)
    w_pad = jnp.zeros((Kp, Cp), jnp.bfloat16).at[:K, :Cout].set(
        w2d.astype(jnp.bfloat16))
    bias_pad = jnp.zeros((1, Cp), jnp.float32).at[0, :Cout].set(
        bias.astype(jnp.float32))
    if Kp != K:
        patches = jnp.pad(patches, ((0, 0), (0, Kp - K)))

    # ---- tile over M; keep >=2 grid steps when possible (v7x megacore) ----
    tm_eff = min(tm, _round_up(M, 8))
    if M > 128 and _round_up(M, tm_eff) // tm_eff < 2:
        tm_eff = max(128, _round_up((M + 1) // 2, 8))
    Mp = _round_up(M, tm_eff)
    if Mp != M:
        patches = jnp.pad(patches, ((0, Mp - M), (0, 0)))

    # ---- hot path: fused matmul + BN bias + ReLU in Pallas ----
    out = pl.pallas_call(
        _simconv_kernel,
        out_shape=jax.ShapeDtypeStruct((Mp, Cp), jnp.float32),
        grid_spec=pltpu.PrefetchScalarGridSpec(
            num_scalar_prefetch=0,
            grid=(Mp // tm_eff,),
            in_specs=[
                pl.BlockSpec((tm_eff, Kp), lambda i: (i, 0)),
                pl.BlockSpec((Kp, Cp), lambda i: (0, 0)),
                pl.BlockSpec((1, Cp), lambda i: (0, 0)),
            ],
            out_specs=pl.BlockSpec((tm_eff, Cp), lambda i: (i, 0)),
        ),
        compiler_params=pltpu.CompilerParams(
            dimension_semantics=("parallel",),
            vmem_limit_bytes=32 * 1024 * 1024,
        ),
    )(patches, w_pad, bias_pad)

    out = out[:M, :Cout]                        # strip M / channel padding
    out = out.reshape(N, Ho, Wo, Cout)          # kernel-native channels-last
    if out_layout == "NHWC":
        return out                              # avoids an extra HBM round-trip
    return out.transpose(0, 3, 1, 2)            # NCHW to match the PyTorch module


def _reference_f32(x, weight, bn_gamma, bn_beta, bn_mean, bn_var,
                   kernel_size, stride, eps=1e-5):
    pad = kernel_size // 2
    y = jax.lax.conv_general_dilated(
        x, weight, window_strides=(stride, stride),
        padding=[(pad, pad), (pad, pad)],
        dimension_numbers=("NCHW", "OIHW", "NCHW"))
    scale = (bn_gamma / jnp.sqrt(bn_var + eps)).reshape(1, -1, 1, 1)
    bias = (bn_beta - bn_mean * bn_gamma / jnp.sqrt(bn_var + eps)).reshape(1, -1, 1, 1)
    return jnp.maximum(y * scale + bias, 0.0)


def _reference_bf16_quant(x, weight, bn_gamma, bn_beta, bn_mean, bn_var,
                          kernel_size, stride, eps=1e-5):
    """Same quantization as the kernel (bf16 operands, f32 accumulate)."""
    pad = kernel_size // 2
    scale = bn_gamma * jax.lax.rsqrt(bn_var + eps)
    bias = (bn_beta - bn_mean * scale).reshape(1, -1, 1, 1)
    xq = x.astype(jnp.bfloat16).astype(jnp.float32)
    wq = (weight * scale[:, None, None, None]).astype(jnp.bfloat16).astype(jnp.float32)
    y = jax.lax.conv_general_dilated(
        xq, wq, window_strides=(stride, stride),
        padding=[(pad, pad), (pad, pad)],
        dimension_numbers=("NCHW", "OIHW", "NCHW"))
    return jnp.maximum(y + bias, 0.0)


if __name__ == "__main__":
    # SimConv(in_channels=4, out_channels=8, kernel_size=3, stride=1)
    N, Cin, H, W = 2, 4, 16, 16
    Cout, k, stride = 8, 3, 1

    key = jax.random.PRNGKey(0)
    kx, kw, kg, kb, km, kv = jax.random.split(key, 6)
    x = jax.random.normal(kx, (N, Cin, H, W), dtype=jnp.float32)
    weight = jax.random.normal(kw, (Cout, Cin, k, k), dtype=jnp.float32) * 0.1
    bn_gamma = 1.0 + 0.1 * jax.random.normal(kg, (Cout,), dtype=jnp.float32)
    bn_beta = 0.1 * jax.random.normal(kb, (Cout,), dtype=jnp.float32)
    bn_mean = 0.05 * jax.random.normal(km, (Cout,), dtype=jnp.float32)
    bn_var = jnp.abs(1.0 + 0.1 * jax.random.normal(kv, (Cout,), dtype=jnp.float32))

    out = simconv_forward(x, weight, bn_gamma, bn_beta, bn_mean, bn_var,
                          kernel_size=k, stride=stride)
    out = jax.block_until_ready(out)
    assert out.shape == (N, Cout, H, W), out.shape

    # Tight check vs a reference quantized exactly like the kernel.
    ref_q = _reference_bf16_quant(x, weight, bn_gamma, bn_beta, bn_mean, bn_var,
                                  kernel_size=k, stride=stride)
    assert jnp.allclose(out, ref_q, atol=2e-3, rtol=2e-3), "mismatch vs bf16 reference"

    # Loose check vs the full-precision reference (bf16 operand rounding only).
    ref = _reference_f32(x, weight, bn_gamma, bn_beta, bn_mean, bn_var,
                         kernel_size=k, stride=stride)
    assert jnp.allclose(out, ref, atol=5e-2, rtol=5e-2), "mismatch vs f32 reference"

    print("KERNEL_OK")
</pallas_src>

<mosaic_0001>
module attributes {stable_mosaic.version = 11 : i64} {
  func.func @_simconv_kernel(%arg0: i32, %arg1: memref<256x128xbf16, #tpu.memory_space<vmem>>, %arg2: memref<128x128xbf16, #tpu.memory_space<vmem>>, %arg3: memref<1x128xf32, #tpu.memory_space<vmem>>, %arg4: memref<256x128xf32, #tpu.memory_space<vmem>>) attributes {dimension_semantics = [#tpu.dimension_semantics<parallel>], iteration_bounds = array<i64: 2>, scalar_prefetch = 0 : i64, scratch_operands = 0 : i64, tpu.core_type = #tpu.core_type<tc>, window_params = [{transform_indices = @transform_0, window_bounds = array<i64: 256, 128>}, {pipeline_mode = #tpu.pipeline_mode<synchronous>, transform_indices = @transform_1, window_bounds = array<i64: 128, 128>}, {pipeline_mode = #tpu.pipeline_mode<synchronous>, transform_indices = @transform_2, window_bounds = array<i64: 1, 128>}, {transform_indices = @transform_3, window_bounds = array<i64: 256, 128>}]} {
    %c0 = arith.constant 0 : index
    %c0_0 = arith.constant 0 : index
    %0 = vector.load %arg1[%c0, %c0_0] : memref<256x128xbf16, #tpu.memory_space<vmem>>, vector<256x128xbf16>
    %c0_1 = arith.constant 0 : index
    %c0_2 = arith.constant 0 : index
    %1 = vector.load %arg2[%c0_1, %c0_2] : memref<128x128xbf16, #tpu.memory_space<vmem>>, vector<128x128xbf16>
    %cst = arith.constant dense<0.000000e+00> : vector<256x128xf32>
    %2 = tpu.matmul %0, %1, %cst {dimension_numbers = #tpu.dot_dimension_numbers<[1], [0], [0], [1], [0, 0, 1, 1], [], []>} : vector<256x128xbf16>, vector<128x128xbf16>, vector<256x128xf32> -> vector<256x128xf32>
    %c0_3 = arith.constant 0 : index
    %c0_4 = arith.constant 0 : index
    %3 = vector.load %arg3[%c0_3, %c0_4] : memref<1x128xf32, #tpu.memory_space<vmem>>, vector<1x128xf32>
    %4 = vector.broadcast %3 : vector<1x128xf32> to vector<256x128xf32>
    %5 = arith.addf %2, %4 : vector<256x128xf32>
    %cst_5 = arith.constant 0.000000e+00 : f32
    %6 = vector.broadcast %cst_5 : f32 to vector<256x128xf32>
    %7 = arith.maximumf %5, %6 : vector<256x128xf32>
    %c0_6 = arith.constant 0 : index
    %c0_7 = arith.constant 0 : index
    %8 = vector.load %arg4[%c0_6, %c0_7] : memref<256x128xf32, #tpu.memory_space<vmem>>, vector<256x128xf32>
    tpu.vector_store %arg4[%c0_6, %c0_7], %7 {strides = array<i32>} : memref<256x128xf32, #tpu.memory_space<vmem>>, vector<256x128xf32>,
    return
  }
  func.func @transform_0(%arg0: i32) -> (i32, i32) {
    %c0_i32 = arith.constant 0 : i32
    %c0_i32_0 = arith.constant 0 : i32
    return %arg0, %c0_i32 : i32, i32
  }
  func.func @transform_1(%arg0: i32) -> (i32, i32) {
    %c0_i32 = arith.constant 0 : i32
    %c0_i32_0 = arith.constant 0 : i32
    %c0_i32_1 = arith.constant 0 : i32
    return %c0_i32, %c0_i32_0 : i32, i32
  }
  func.func @transform_2(%arg0: i32) -> (i32, i32) {
    %c0_i32 = arith.constant 0 : i32
    %c0_i32_0 = arith.constant 0 : i32
    %c0_i32_1 = arith.constant 0 : i32
    return %c0_i32, %c0_i32_0 : i32, i32
  }
  func.func @transform_3(%arg0: i32) -> (i32, i32) {
    %c0_i32 = arith.constant 0 : i32
    %c0_i32_0 = arith.constant 0 : i32
    return %arg0, %c0_i32 : i32, i32
  }
}

</mosaic_0001>

<bundles_post_ra>
// kernel: simconv_forward.1
= control target key start
LH: loop header
LB: loop body
LE: loop exit
PB: predicated region body
PF: predicated region fallthrough
CT: control target
= control target key end

     0   :  { %s839_s12 = smov 0   ;;  %s973_s0 = inlined_call_operand.vmem [shape: bf16[512,128], index: 0, kind: input, shape index: {}]   ;;  %s974_s1 = inlined_call_operand.vmem [shape: bf16[128,128], index: 1, kind: input, shape index: {}]   ;;  %s975_s2 = inlined_call_operand.vmem [shape: f32[1,128], index: 2, kind: input, shape index: {}]   ;;  %s976_s3 = inlined_call_operand.vmem [shape: f32[512,128], index: 3, kind: output, shape index: {}]  }
   0x1 LB: > { %s655_s13 = sadd.s32 4294967295, %s817_s12   ;;  %p659_p0 = scmp.ge.s32.totalorder %s817_s12, 1  ;;  %s817_s12 = sphi %s839_s12, %s13_s12  }
   0x2   : > { %p138_p1 = scmp.lt.s32.totalorder %s817_s12, 3 }
   0x4   : > { %p139_p2 = pnand %p659_p0, %p138_p1 }
   0x5   : > { %s660_s16 = sshll.u32 (!%p139_p2), %s655_s13, 5 }
   0x6   : > { %142 = sbr.rel (%p139_p2) target bundleno = 272 (0x110), region = 32  ;;  %p163_p3 = scmp.lt.s32.totalorder (!%p139_p2), %s660_s16, 63 }
   0xb   : > { %v787_v0 = vld [vmem:[%s974_s1 + $0x38] sm:$0xff]   ;;  %v788_v1 = vld [vmem:[%s974_s1 + $0x30] sm:$0xff]   ;;  %s978_s16 = smov (!%p163_p3, %s660_s16), 63  ;;  %v789_v2 = vld [vmem:[%s974_s1 + $0x28] sm:$0xff]  }
   0xc   : > { %715 = vmatprep.subr.bf16.mxu0 %v787_v0  ;;  %763 = vmatprep.subr.bf16.mxu1 %v787_v0  ;;  %s661_s21 = sshll.u32 %s978_s16, 2  ;;  %v790_v3 = vld [vmem:[%s974_s1 + $0x20] sm:$0xff]   ;;  %v791_v6 = vld [vmem:[%s974_s1 + $0x18] sm:$0xff]   ;;  %v792_v7 = vld [vmem:[%s974_s1 + $0x10] sm:$0xff]   ;;  %s663_s10 = sshll.u32 %s978_s16, 3 }
   0xd   : > { %716 = vmatpush3.bf16.msra.mxu0 %v787_v0  ;;  %771 = vmatpush3.bf16.msra.mxu1 %v787_v0  ;;  %s862_s24 = scalar_lea.vmem %s973_s0, %s661_s21  ;;  %v793_v8 = vld [vmem:[%s974_s1 + $0x8] sm:$0xff]   ;;  %v794_v9 = vld [vmem:[%s974_s1] sm:$0xff]   ;;  %s906_s14 = scalar_lea.vmem %s976_s3, %s663_s10 }
   0xe   : > { %717 = vmatprep.subr.bf16.mxu0 %v788_v1  ;;  %764 = vmatprep.subr.bf16.mxu1 %v788_v1  ;;  %v795_v4 = vld [vmem:[%s862_s24] sm:$0xff]   ;;  %v797_v10 = vld [vmem:[%s862_s24 + $0x8] sm:$0xff]   ;;  %v799_v12 = vld [vmem:[%s862_s24 + $0x10] sm:$0xff]  }
   0xf   : > { %v796_v5 = vld [vmem:[%s862_s24 + $0x40] sm:$0xff]   ;;  %731 = vmatprep.mubr.bf16.mxu0 %v795_v4  ;;  %v798_v11 = vld [vmem:[%s862_s24 + $0x48] sm:$0xff]   ;;  %v800_v13 = vld [vmem:[%s862_s24 + $0x50] sm:$0xff]  }
  0x10   : > { %747 = vmatprep.mubr.bf16.mxu1 %v796_v5  ;;  %v801_v14 = vld [vmem:[%s862_s24 + $0x18] sm:$0xff]   ;;  %v803_v16 = vld [vmem:[%s862_s24 + $0x20] sm:$0xff]   ;;  %v805_v18 = vld [vmem:[%s862_s24 + $0x28] sm:$0xff]  }
  0x11   : > { %718 = vmatpush3.bf16.msra.mxu0 %v788_v1  ;;  %772 = vmatpush3.bf16.msra.mxu1 %v788_v1  ;;  %v802_v15 = vld [vmem:[%s862_s24 + $0x58] sm:$0xff]   ;;  %v804_v17 = vld [vmem:[%s862_s24 + $0x60] sm:$0xff]   ;;  %v806_v19 = vld [vmem:[%s862_s24 + $0x68] sm:$0xff]  }
  0x12   : > { %719 = vmatprep.subr.bf16.mxu0 %v789_v2  ;;  %765 = vmatprep.subr.bf16.mxu1 %v789_v2  ;;  %v807_v20 = vld [vmem:[%s862_s24 + $0x30] sm:$0xff]   ;;  %v809_v22 = vld [vmem:[%s862_s24 + $0x38] sm:$0xff]   ;;  %v898_v24 = vld [vmem:[%s975_s2] ss:$0 sm:$0xff] }
  0x13   : > { %v808_v21 = vld [vmem:[%s862_s24 + $0x70] sm:$0xff]   ;;  %v810_v23 = vld [vmem:[%s862_s24 + $0x78] sm:$0xff]  }
  0x15   : > { %720 = vmatpush3.bf16.msra.mxu0 %v789_v2  ;;  %773 = vmatpush3.bf16.msra.mxu1 %v789_v2 }
  0x16   : > { %721 = vmatprep.subr.bf16.mxu0 %v790_v3  ;;  %766 = vmatprep.subr.bf16.mxu1 %v790_v3 }
  0x19   : > { %722 = vmatpush3.bf16.msra.mxu0 %v790_v3  ;;  %774 = vmatpush3.bf16.msra.mxu1 %v790_v3 }
  0x1a   : > { %723 = vmatprep.subr.bf16.mxu0 %v791_v6  ;;  %767 = vmatprep.subr.bf16.mxu1 %v791_v6 }
  0x1d   : > { %724 = vmatpush3.bf16.msra.mxu0 %v791_v6  ;;  %775 = vmatpush3.bf16.msra.mxu1 %v791_v6 }
  0x1e   : > { %725 = vmatprep.subr.bf16.mxu0 %v792_v7  ;;  %768 = vmatprep.subr.bf16.mxu1 %v792_v7 }
  0x21   : > { %726 = vmatpush3.bf16.msra.mxu0 %v792_v7  ;;  %776 = vmatpush3.bf16.msra.mxu1 %v792_v7 }
  0x22   : > { %727 = vmatprep.subr.bf16.mxu0 %v793_v8  ;;  %769 = vmatprep.subr.bf16.mxu1 %v793_v8 }
  0x25   : > { %728 = vmatpush3.bf16.msra.mxu0 %v793_v8  ;;  %777 = vmatpush3.bf16.msra.mxu1 %v793_v8 }
  0x26   : > { %729 = vmatprep.subr.bf16.mxu0 %v794_v9  ;;  %770 = vmatprep.subr.bf16.mxu1 %v794_v9 }
  0x29   : > { %730 = vmatpush3.bf16.msra.mxu0 %v794_v9  ;;  %778 = vmatpush3.bf16.msra.mxu1 %v794_v9 }
  0x2c   : > { %732 = vmatmul.mubr.bf16.vlgmr.msra.gmra.mxu0 %v797_v10  ;;  %748 = vmatmul.mubr.bf16.vlgmr.msra.gmra.mxu1 %v798_v11 }
  0x2d   : > { %735 = vmatprep.mubr.bf16.mxu0 %v799_v12  ;;  %751 = vmatprep.mubr.bf16.mxu1 %v800_v13 }
  0x34   : > { %736 = vmatmul.mubr.bf16.gmra.mxu0 %v801_v14  ;;  %752 = vmatmul.mubr.bf16.gmra.mxu1 %v802_v15 }
  0x35   : > { %739 = vmatprep.mubr.bf16.mxu0 %v803_v16  ;;  %755 = vmatprep.mubr.bf16.mxu1 %v804_v17 }
  0x3c   : > { %740 = vmatmul.mubr.bf16.gmra.mxu0 %v805_v18  ;;  %756 = vmatmul.mubr.bf16.gmra.mxu1 %v806_v19 }
  0x3d   : > { %743 = vmatprep.mubr.bf16.mxu0 %v807_v20  ;;  %759 = vmatprep.mubr.bf16.mxu1 %v808_v21 }
  0x44   : > { %744 = vmatmul.mubr.bf16.gmra.mxu0 %v809_v22  ;;  %760 = vmatmul.mubr.bf16.gmra.mxu1 %v810_v23 }
  0xec   : > { %v733_v25 = vpop.f32.mrf.mxu0  ;;  %v749_v26 = vpop.f32.mrf.mxu1 }
  0xed   : > { %v417_v27 = vadd.f32 %v733_v25, %v898_v24  ;;  %v481_v28 = vadd.f32 %v749_v26, %v898_v24 }
  0xee   : > { %v408_v29 = vpop.f32.mrf.mxu0  ;;  %v472_v30 = vpop.f32.mrf.mxu1 }
  0xef   : > { %v537_v31 = vmax.f32 %v417_v27, 0.0  ;;  %v553_v32 = vmax.f32 %v481_v28, 0.0  ;;  %v409_v33 = vadd.f32 %v898_v24, %v408_v29  ;;  %v473_v34 = vadd.f32 %v898_v24, %v472_v30 }
  0xf0   : > { %v734_v35 = vpop.f32.mrf.mxu0  ;;  %v750_v36 = vpop.f32.mrf.mxu1 }
  0xf1   : > { %569 = vst [vmem:[%s906_s14 + $0x10] sm:$0xff] %v537_v31  ;;  %585 = vst [vmem:[%s906_s14 + $0x90] sm:$0xff] %v553_v32  ;;  %v535_v37 = vmax.f32 %v409_v33, 0.0  ;;  %v551_v38 = vmax.f32 %v473_v34, 0.0  ;;  %v420_v39 = vadd.f32 %v734_v35, %v898_v24  ;;  %v484_v40 = vadd.f32 %v750_v36, %v898_v24 }
  0xf2   : > { %v411_v41 = vpop.f32.mrf.mxu0  ;;  %v475_v42 = vpop.f32.mrf.mxu1 }
  0xf3   : > { %567 = vst [vmem:[%s906_s14] sm:$0xff] %v535_v37  ;;  %583 = vst [vmem:[%s906_s14 + $0x80] sm:$0xff] %v551_v38  ;;  %v538_v43 = vmax.f32 %v420_v39, 0.0  ;;  %v554_v44 = vmax.f32 %v484_v40, 0.0  ;;  %v412_v45 = vadd.f32 %v898_v24, %v411_v41  ;;  %v476_v46 = vadd.f32 %v898_v24, %v475_v42 }
  0xf4   : > { %v737_v47 = vpop.f32.mrf.mxu0  ;;  %v753_v48 = vpop.f32.mrf.mxu1 }
  0xf5   : > { %570 = vst [vmem:[%s906_s14 + $0x18] sm:$0xff] %v538_v43  ;;  %586 = vst [vmem:[%s906_s14 + $0x98] sm:$0xff] %v554_v44  ;;  %v536_v49 = vmax.f32 %v412_v45, 0.0  ;;  %v552_v50 = vmax.f32 %v476_v46, 0.0  ;;  %v433_v51 = vadd.f32 %v737_v47, %v898_v24  ;;  %v497_v52 = vadd.f32 %v753_v48, %v898_v24 }
  0xf6   : > { %v424_v53 = vpop.f32.mrf.mxu0  ;;  %v488_v54 = vpop.f32.mrf.mxu1 }
  0xf7   : > { %568 = vst [vmem:[%s906_s14 + $0x8] sm:$0xff] %v536_v49  ;;  %584 = vst [vmem:[%s906_s14 + $0x88] sm:$0xff] %v552_v50  ;;  %v541_v55 = vmax.f32 %v433_v51, 0.0  ;;  %v557_v56 = vmax.f32 %v497_v52, 0.0  ;;  %v425_v57 = vadd.f32 %v898_v24, %v424_v53  ;;  %v489_v58 = vadd.f32 %v898_v24, %v488_v54 }
  0xf8   : > { %v738_v59 = vpop.f32.mrf.mxu0  ;;  %v754_v60 = vpop.f32.mrf.mxu1 }
  0xf9   : > { %573 = vst [vmem:[%s906_s14 + $0x30] sm:$0xff] %v541_v55  ;;  %589 = vst [vmem:[%s906_s14 + $0xb0] sm:$0xff] %v557_v56  ;;  %v539_v61 = vmax.f32 %v425_v57, 0.0  ;;  %v555_v62 = vmax.f32 %v489_v58, 0.0  ;;  %v436_v63 = vadd.f32 %v738_v59, %v898_v24  ;;  %v500_v0 = vadd.f32 %v754_v60, %v898_v24 }
  0xfa   : > { %v427_v1 = vpop.f32.mrf.mxu0  ;;  %v491_v2 = vpop.f32.mrf.mxu1 }
  0xfb   : > { %571 = vst [vmem:[%s906_s14 + $0x20] sm:$0xff] %v539_v61  ;;  %587 = vst [vmem:[%s906_s14 + $0xa0] sm:$0xff] %v555_v62  ;;  %v542_v3 = vmax.f32 %v436_v63, 0.0  ;;  %v558_v4 = vmax.f32 %v500_v0, 0.0  ;;  %v428_v5 = vadd.f32 %v898_v24, %v427_v1  ;;  %v492_v6 = vadd.f32 %v898_v24, %v491_v2 }
  0xfc   : > { %v741_v7 = vpop.f32.mrf.mxu0  ;;  %v757_v8 = vpop.f32.mrf.mxu1 }
  0xfd   : > { %574 = vst [vmem:[%s906_s14 + $0x38] sm:$0xff] %v542_v3  ;;  %590 = vst [vmem:[%s906_s14 + $0xb8] sm:$0xff] %v558_v4  ;;  %v540_v9 = vmax.f32 %v428_v5, 0.0  ;;  %v556_v10 = vmax.f32 %v492_v6, 0.0  ;;  %v449_v11 = vadd.f32 %v741_v7, %v898_v24  ;;  %v513_v12 = vadd.f32 %v757_v8, %v898_v24 }
  0xfe   : > { %v440_v13 = vpop.f32.mrf.mxu0  ;;  %v504_v14 = vpop.f32.mrf.mxu1 }
  0xff   : > { %572 = vst [vmem:[%s906_s14 + $0x28] sm:$0xff] %v540_v9  ;;  %588 = vst [vmem:[%s906_s14 + $0xa8] sm:$0xff] %v556_v10  ;;  %v545_v15 = vmax.f32 %v449_v11, 0.0  ;;  %v561_v16 = vmax.f32 %v513_v12, 0.0  ;;  %v441_v17 = vadd.f32 %v898_v24, %v440_v13  ;;  %v505_v18 = vadd.f32 %v898_v24, %v504_v14 }
 0x100   : > { %v742_v19 = vpop.f32.mrf.mxu0  ;;  %v758_v20 = vpop.f32.mrf.mxu1 }
 0x101   : > { %577 = vst [vmem:[%s906_s14 + $0x50] sm:$0xff] %v545_v15  ;;  %593 = vst [vmem:[%s906_s14 + $0xd0] sm:$0xff] %v561_v16  ;;  %v543_v21 = vmax.f32 %v441_v17, 0.0  ;;  %v559_v22 = vmax.f32 %v505_v18, 0.0  ;;  %v452_v23 = vadd.f32 %v742_v19, %v898_v24  ;;  %v516_v25 = vadd.f32 %v758_v20, %v898_v24 }
 0x102   : > { %v443_v26 = vpop.f32.mrf.mxu0  ;;  %v507_v27 = vpop.f32.mrf.mxu1 }
 0x103   : > { %575 = vst [vmem:[%s906_s14 + $0x40] sm:$0xff] %v543_v21  ;;  %591 = vst [vmem:[%s906_s14 + $0xc0] sm:$0xff] %v559_v22  ;;  %v546_v28 = vmax.f32 %v452_v23, 0.0  ;;  %v562_v29 = vmax.f32 %v516_v25, 0.0  ;;  %v444_v30 = vadd.f32 %v898_v24, %v443_v26  ;;  %v508_v31 = vadd.f32 %v898_v24, %v507_v27 }
 0x104   : > { %v745_v32 = vpop.f32.mrf.mxu0  ;;  %v761_v33 = vpop.f32.mrf.mxu1 }
 0x105   : > { %578 = vst [vmem:[%s906_s14 + $0x58] sm:$0xff] %v546_v28  ;;  %594 = vst [vmem:[%s906_s14 + $0xd8] sm:$0xff] %v562_v29  ;;  %v544_v34 = vmax.f32 %v444_v30, 0.0  ;;  %v560_v35 = vmax.f32 %v508_v31, 0.0  ;;  %v465_v36 = vadd.f32 %v745_v32, %v898_v24  ;;  %v529_v37 = vadd.f32 %v761_v33, %v898_v24 }
 0x106   : > { %v456_v38 = vpop.f32.mrf.mxu0  ;;  %v520_v39 = vpop.f32.mrf.mxu1 }
 0x107   : > { %576 = vst [vmem:[%s906_s14 + $0x48] sm:$0xff] %v544_v34  ;;  %592 = vst [vmem:[%s906_s14 + $0xc8] sm:$0xff] %v560_v35  ;;  %v549_v40 = vmax.f32 %v465_v36, 0.0  ;;  %v565_v41 = vmax.f32 %v529_v37, 0.0  ;;  %v457_v42 = vadd.f32 %v898_v24, %v456_v38  ;;  %v521_v43 = vadd.f32 %v898_v24, %v520_v39 }
 0x108   : > { %v746_v44 = vpop.f32.mrf.mxu0  ;;  %v762_v45 = vpop.f32.mrf.mxu1 }
 0x109   : > { %581 = vst [vmem:[%s906_s14 + $0x70] sm:$0xff] %v549_v40  ;;  %597 = vst [vmem:[%s906_s14 + $0xf0] sm:$0xff] %v565_v41  ;;  %v547_v46 = vmax.f32 %v457_v42, 0.0  ;;  %v563_v47 = vmax.f32 %v521_v43, 0.0  ;;  %v468_v48 = vadd.f32 %v746_v44, %v898_v24  ;;  %v532_v49 = vadd.f32 %v762_v45, %v898_v24 }
 0x10a   : > { %v459_v50 = vpop.f32.mrf.mxu0  ;;  %v523_v51 = vpop.f32.mrf.mxu1 }
 0x10b   : > { %579 = vst [vmem:[%s906_s14 + $0x60] sm:$0xff] %v547_v46  ;;  %595 = vst [vmem:[%s906_s14 + $0xe0] sm:$0xff] %v563_v47  ;;  %v550_v52 = vmax.f32 %v468_v48, 0.0  ;;  %v566_v53 = vmax.f32 %v532_v49, 0.0  ;;  %v460_v54 = vadd.f32 %v898_v24, %v459_v50  ;;  %v524_v55 = vadd.f32 %v898_v24, %v523_v51 }
 0x10d   : > { %582 = vst [vmem:[%s906_s14 + $0x78] sm:$0xff] %v550_v52  ;;  %598 = vst [vmem:[%s906_s14 + $0xf8] sm:$0xff] %v566_v53  ;;  %v548_v56 = vmax.f32 %v460_v54, 0.0  ;;  %v564_v57 = vmax.f32 %v524_v55, 0.0 }
 0x10f   : > { %580 = vst [vmem:[%s906_s14 + $0x68] sm:$0xff] %v548_v56  ;;  %596 = vst [vmem:[%s906_s14 + $0xe8] sm:$0xff] %v564_v57 }
 0x110 PF: > { %s13_s12 = sadd.s32 1, %s817_s12  }
 0x111   : > { %p10_p4 = scmp.ge.s32.totalorder %s13_s12, 4  }
 0x113   :  { %12 = sbr.rel (!%p10_p4) target bundleno = 1 (0x1), region = 62 }

</bundles_post_ra>
